<compile_context>
chip_gen: v5e
topology: v5e:2x2
jax: 0.10.0
libtpu: 0.0.40
codegen_flags: <defaults>
</compile_context>

<pallas_src>
import functools

import jax
import jax.numpy as jnp
from jax import lax
from jax.experimental import pallas as pl
from jax.experimental.pallas import tpu as pltpu


def _round_up(x: int, m: int) -> int:
    return (x + m - 1) // m * m


def _proj_lse_kernel(x_ref, w_ref, b_ref, logits_ref, lse_ref, m_sc, l_sc):
    """Grid = (row_tiles, vocab_tiles).

    Each step: logits tile = x_tile @ w_tile^T + b_tile (bf16 MXU, f32 acc),
    written straight to the logits output, while running max / running sum
    (online LSE) accumulate in VMEM scratch.  The per-row LSE is written on
    the last vocab tile; the caller applies `logits - lse` as an epilogue.
    """
    j = pl.program_id(1)

    @pl.when(j == 0)
    def _init():
        m_sc[...] = jnp.full_like(m_sc, -jnp.inf)
        l_sc[...] = jnp.zeros_like(l_sc)

    # (tm, D) x (tn, D) contracting on D -> (tm, tn); no weight transpose.
    logits = lax.dot_general(
        x_ref[...], w_ref[...],
        dimension_numbers=(((1,), (1,)), ((), ())),
        preferred_element_type=jnp.float32,
    ) + b_ref[...]
    logits_ref[...] = logits.astype(logits_ref.dtype)

    m_old = m_sc[...]
    m_new = jnp.maximum(m_old, jnp.max(logits, axis=-1, keepdims=True))
    l_sc[...] = (jnp.exp(m_old - m_new) * l_sc[...]
                 + jnp.sum(jnp.exp(logits - m_new), axis=-1, keepdims=True))
    m_sc[...] = m_new

    @pl.when(j == pl.num_programs(1) - 1)
    def _emit_lse():
        lse_ref[...] = m_sc[...] + jnp.log(l_sc[...])


def prepare_projection_params(weight, bias, *, tn: int = 512):
    """One-time (init-time) parameter prep: bf16 cast + vocab padding.

    weight: (V, D) f32, bias: (V,) f32.  Returns (w_bf16 (Vp, D), bias2d
    (1, Vp) f32, V, tn_eff).  Padded vocab entries get zero weights and a
    -1e30 bias so they never perturb the log-softmax normalizer.
    """
    V, D = weight.shape
    assert bias.shape == (V,)
    tn = _round_up(min(int(tn), _round_up(V, 128)), 128)
    Vp = _round_up(V, tn)
    w = weight.astype(jnp.bfloat16)
    b = bias.astype(jnp.float32)
    if Vp != V:
        w = jnp.pad(w, ((0, Vp - V), (0, 0)))
        b = jnp.pad(b, (0, Vp - V), constant_values=-1e30)
    return w, b.reshape(1, Vp), V, tn


@functools.partial(
    jax.jit,
    static_argnames=("vocab_size", "tm", "tn", "out_dtype", "logits_dtype"))
def projection_layer_apply(x, w, b2d, *, vocab_size, tm: int = 256,
                           tn: int = 512, out_dtype=jnp.float32,
                           logits_dtype=jnp.float32):
    """Hot path: log_softmax(x @ w.T + b, axis=-1) with prepped params.

    x: (B, S, D) f32; w: (Vp, D) bf16 (from prepare_projection_params);
    b2d: (1, Vp) f32.  Returns (B, S, vocab_size) in out_dtype.
    Set logits_dtype=jnp.bfloat16 to halve the intermediate HBM stream
    (~1e-2 log-prob tolerance).
    """
    B, S, D = x.shape
    Vp, Dw = w.shape
    assert Dw == D and b2d.shape == (1, Vp)
    assert Vp % tn == 0, "tn must match prepare_projection_params"
    M = B * S
    nv = Vp // tn

    # Row tiling: multiple of 8, clamped for tiny shapes so we don't over-pad.
    tm = _round_up(min(int(tm), _round_up(M, 8)), 8)
    Mp = _round_up(M, tm)
    x2d = x.reshape(M, D).astype(jnp.bfloat16)
    if Mp != M:
        x2d = jnp.pad(x2d, ((0, Mp - M), (0, 0)))

    lg_bytes = jnp.dtype(logits_dtype).itemsize
    # Honest VMEM budget: double-buffered tiles; (tm,1) buffers lane-pad to
    # (tm,128); (1,tn) bias sublane-pads to (8,tn).
    needed = (2 * tm * D * 2            # x tile (bf16) x2 (resident over j)
              + 2 * tn * D * 2          # streamed weight tile (bf16) x2
              + 2 * 8 * tn * 4          # bias tile x2 (sublane-padded)
              + 2 * tm * tn * lg_bytes  # logits out tile x2
              + 2 * tm * 128 * 4        # lse out tile x2 (lane-padded)
              + 2 * tm * 128 * 4)       # running max/sum scratch (lane-padded)
    try:
        vmem_cap = pltpu.get_tpu_info().vmem_capacity_bytes
    except Exception:
        vmem_cap = 64 << 20             # conservative: v7x per-TC VMEM
    vmem_limit = min(max(int(needed * 1.5) + (4 << 20), 32 << 20),
                     vmem_cap - (8 << 20))

    cost = pl.CostEstimate(
        flops=2 * Mp * D * Vp,
        transcendentals=Mp * Vp,                      # exp per logit
        bytes_accessed=(Mp * D * 2                    # x (bf16)
                        + (Mp // tm) * Vp * D * 2     # weight re-streamed/row tile
                        + (Mp // tm) * Vp * 4         # bias re-streamed
                        + Mp * Vp * lg_bytes          # logits write
                        + Mp * 4),                    # lse write
    )

    logits, lse = pl.pallas_call(
        _proj_lse_kernel,
        out_shape=(jax.ShapeDtypeStruct((Mp, Vp), logits_dtype),
                   jax.ShapeDtypeStruct((Mp, 1), jnp.float32)),
        grid_spec=pltpu.PrefetchScalarGridSpec(
            num_scalar_prefetch=0,
            grid=(Mp // tm, nv),
            in_specs=[
                # Row tile: VMEM-resident across the vocab sweep.
                pl.BlockSpec((tm, D), lambda i, j: (i, 0)),
                # Streamed weight vocab tile, native (V, D) layout.
                # TODO(synk): add pipeline_mode=pl.Buffered(3) here if profiling
                # shows exposed weight-DMA latency after the tm raise.
                pl.BlockSpec((tn, D), lambda i, j: (j, 0)),
                # Streamed bias tile.
                pl.BlockSpec((1, tn), lambda i, j: (0, j)),
            ],
            out_specs=[
                pl.BlockSpec((tm, tn), lambda i, j: (i, j)),   # raw logits
                pl.BlockSpec((tm, 1), lambda i, j: (i, 0)),    # per-row LSE
            ],
            scratch_shapes=[
                pltpu.VMEM((tm, 1), jnp.float32),   # running max
                pltpu.VMEM((tm, 1), jnp.float32),   # running sum
            ],
        ),
        compiler_params=pltpu.CompilerParams(
            dimension_semantics=("parallel", "arbitrary"),
            vmem_limit_bytes=vmem_limit,
        ),
        cost_estimate=cost,
    )(x2d, w, b2d)

    # Finalize: log_softmax = logits - lse.  Pure elementwise broadcast
    # subtract; under jit XLA fuses the un-padding slice, subtract, cast and
    # reshape into a single pass over (M, V), so no tm*Vp VMEM logits stash is
    # needed and the Pallas kernel fits v7x's 64 MiB at real vocab sizes.
    # TODO(synk): for tiny-M decode shapes on v7x, split the vocab axis across
    # the two TensorCores and combine (m, l) with a cross-core reduce.
    out = (logits[:M, :vocab_size].astype(jnp.float32) - lse[:M]).astype(out_dtype)
    return out.reshape(B, S, vocab_size)


def projection_layer(x, weight, bias, *, tm: int = 256, tn: int = 512,
                     out_dtype=jnp.float32):
    """One-shot convenience wrapper (prep + apply).  Prefer calling
    prepare_projection_params once at init and projection_layer_apply per step."""
    w, b2d, vocab, tn = prepare_projection_params(weight, bias, tn=tn)
    return projection_layer_apply(x, w, b2d, vocab_size=vocab, tm=tm, tn=tn,
                                  out_dtype=out_dtype)


if __name__ == "__main__":
    # Small shapes consistent with the module's forward: (batch, seq, d_model).
    # Chosen to also exercise row padding (M=14), vocab padding (1000 -> 1024),
    # and multiple vocab tiles (tn=256 -> 4 tiles).
    B, S, D, V = 2, 7, 128, 1000

    key = jax.random.PRNGKey(0)
    kx, kw, kb = jax.random.split(key, 3)

    x = jax.random.normal(kx, (B, S, D), dtype=jnp.float32)
    # Deterministic synthetic nn.Linear parameters (uniform like PyTorch default)
    bound = 1.0 / (D ** 0.5)
    weight = jax.random.uniform(kw, (V, D), minval=-bound, maxval=bound,
                                dtype=jnp.float32)
    bias = jax.random.uniform(kb, (V,), minval=-bound, maxval=bound,
                              dtype=jnp.float32)

    # Init-time prep (hoisted out of the hot path), then the hot apply call.
    w_p, b_p, vocab, tn_p = prepare_projection_params(weight, bias, tn=256)
    out = projection_layer_apply(x, w_p, b_p, vocab_size=vocab, tm=128, tn=tn_p)
    out = jax.block_until_ready(out)

    # Reference at matched operand precision (bf16 matmul inputs, f32 math).
    xb = x.astype(jnp.bfloat16).astype(jnp.float32)
    wb = weight.astype(jnp.bfloat16).astype(jnp.float32)
    logits_ref = jnp.einsum("bsd,vd->bsv", xb, wb) + bias
    ref = jax.nn.log_softmax(logits_ref, axis=-1)

    assert out.shape == (B, S, V)
    assert bool(jnp.allclose(out, ref, atol=2e-3, rtol=2e-3)), \
        "kernel output does not match reference"

    print("KERNEL_OK")
</pallas_src>

<mosaic_0001>
module attributes {stable_mosaic.version = 11 : i64} {
  func.func @_proj_lse_kernel(%arg0: i32, %arg1: i32, %arg2: memref<16x128xbf16, #tpu.memory_space<vmem>>, %arg3: memref<256x128xbf16, #tpu.memory_space<vmem>>, %arg4: memref<1x256xf32, #tpu.memory_space<vmem>>, %arg5: memref<16x256xf32, #tpu.memory_space<vmem>>, %arg6: memref<16x1xf32, #tpu.memory_space<vmem>>, %arg7: memref<16x1xf32, #tpu.memory_space<vmem>>, %arg8: memref<16x1xf32, #tpu.memory_space<vmem>>) attributes {dimension_semantics = [#tpu.dimension_semantics<parallel>, #tpu.dimension_semantics<arbitrary>], iteration_bounds = array<i64: 1, 4>, scalar_prefetch = 0 : i64, scratch_operands = 2 : i64, tpu.core_type = #tpu.core_type<tc>, window_params = [{transform_indices = @transform_0, window_bounds = array<i64: 16, 128>}, {transform_indices = @transform_1, window_bounds = array<i64: 256, 128>}, {transform_indices = @transform_2, window_bounds = array<i64: 1, 256>}, {transform_indices = @transform_3, window_bounds = array<i64: 16, 256>}, {transform_indices = @transform_4, window_bounds = array<i64: 16, 1>}]} {
    %c0_i32 = arith.constant 0 : i32
    %0 = arith.cmpi eq, %arg1, %c0_i32 : i32
    %1 = arith.extui %0 : i1 to i32
    %c0_i32_0 = arith.constant 0 : i32
    %2 = arith.cmpi ne, %1, %c0_i32_0 : i32
    scf.if %2 {
      %cst_19 = arith.constant 0xFF800000 : f32
      %29 = vector.broadcast %cst_19 : f32 to vector<16x1xf32>
      %c0_20 = arith.constant 0 : index
      %c0_21 = arith.constant 0 : index
      %30 = vector.load %arg7[%c0_20, %c0_21] : memref<16x1xf32, #tpu.memory_space<vmem>>, vector<16x1xf32>
      tpu.vector_store %arg7[%c0_20, %c0_21], %29 {strides = array<i32>} : memref<16x1xf32, #tpu.memory_space<vmem>>, vector<16x1xf32>,
      %cst_22 = arith.constant 0.000000e+00 : f32
      %31 = vector.broadcast %cst_22 : f32 to vector<16x1xf32>
      %c0_23 = arith.constant 0 : index
      %c0_24 = arith.constant 0 : index
      %32 = vector.load %arg8[%c0_23, %c0_24] : memref<16x1xf32, #tpu.memory_space<vmem>>, vector<16x1xf32>
      tpu.vector_store %arg8[%c0_23, %c0_24], %31 {strides = array<i32>} : memref<16x1xf32, #tpu.memory_space<vmem>>, vector<16x1xf32>,
    } else {
    }
    %c0 = arith.constant 0 : index
    %c0_1 = arith.constant 0 : index
    %3 = vector.load %arg2[%c0, %c0_1] : memref<16x128xbf16, #tpu.memory_space<vmem>>, vector<16x128xbf16>
    %c0_2 = arith.constant 0 : index
    %c0_3 = arith.constant 0 : index
    %4 = vector.load %arg3[%c0_2, %c0_3] : memref<256x128xbf16, #tpu.memory_space<vmem>>, vector<256x128xbf16>
    %cst = arith.constant dense<0.000000e+00> : vector<16x256xf32>
    %5 = tpu.matmul %3, %4, %cst {dimension_numbers = #tpu.dot_dimension_numbers<[1], [1], [0], [0], [0, 0, 1, 0], [], []>} : vector<16x128xbf16>, vector<256x128xbf16>, vector<16x256xf32> -> vector<16x256xf32>
    %c0_4 = arith.constant 0 : index
    %c0_5 = arith.constant 0 : index
    %6 = vector.load %arg4[%c0_4, %c0_5] : memref<1x256xf32, #tpu.memory_space<vmem>>, vector<1x256xf32>
    %7 = vector.broadcast %6 : vector<1x256xf32> to vector<16x256xf32>
    %8 = arith.addf %5, %7 : vector<16x256xf32>
    %c0_6 = arith.constant 0 : index
    %c0_7 = arith.constant 0 : index
    %9 = vector.load %arg5[%c0_6, %c0_7] : memref<16x256xf32, #tpu.memory_space<vmem>>, vector<16x256xf32>
    tpu.vector_store %arg5[%c0_6, %c0_7], %8 {strides = array<i32>} : memref<16x256xf32, #tpu.memory_space<vmem>>, vector<16x256xf32>,
    %c0_8 = arith.constant 0 : index
    %c0_9 = arith.constant 0 : index
    %10 = vector.load %arg7[%c0_8, %c0_9] : memref<16x1xf32, #tpu.memory_space<vmem>>, vector<16x1xf32>
    %cst_10 = arith.constant dense<0xFF800000> : vector<16xf32>
    %11 = vector.multi_reduction <maximumf>, %8, %cst_10 [1] : vector<16x256xf32> to vector<16xf32>
    %12 = vector.shape_cast %11 : vector<16xf32> to vector<16x1xf32>
    %13 = arith.maximumf %10, %12 : vector<16x1xf32>
    %14 = arith.subf %10, %13 : vector<16x1xf32>
    %15 = math.exp %14 : vector<16x1xf32>
    %c0_11 = arith.constant 0 : index
    %c0_12 = arith.constant 0 : index
    %16 = vector.load %arg8[%c0_11, %c0_12] : memref<16x1xf32, #tpu.memory_space<vmem>>, vector<16x1xf32>
    %17 = arith.mulf %15, %16 : vector<16x1xf32>
    %18 = vector.broadcast %13 : vector<16x1xf32> to vector<16x256xf32>
    %19 = arith.subf %8, %18 : vector<16x256xf32>
    %20 = math.exp %19 : vector<16x256xf32>
    %cst_13 = arith.constant dense<0.000000e+00> : vector<16xf32>
    %21 = vector.multi_reduction <add>, %20, %cst_13 [1] : vector<16x256xf32> to vector<16xf32>
    %22 = vector.shape_cast %21 : vector<16xf32> to vector<16x1xf32>
    %23 = arith.addf %17, %22 : vector<16x1xf32>
    %c0_14 = arith.constant 0 : index
    %c0_15 = arith.constant 0 : index
    %24 = vector.load %arg8[%c0_14, %c0_15] : memref<16x1xf32, #tpu.memory_space<vmem>>, vector<16x1xf32>
    tpu.vector_store %arg8[%c0_14, %c0_15], %23 {strides = array<i32>} : memref<16x1xf32, #tpu.memory_space<vmem>>, vector<16x1xf32>,
    %c0_16 = arith.constant 0 : index
    %c0_17 = arith.constant 0 : index
    %25 = vector.load %arg7[%c0_16, %c0_17] : memref<16x1xf32, #tpu.memory_space<vmem>>, vector<16x1xf32>
    tpu.vector_store %arg7[%c0_16, %c0_17], %13 {strides = array<i32>} : memref<16x1xf32, #tpu.memory_space<vmem>>, vector<16x1xf32>,
    %c3_i32 = arith.constant 3 : i32
    %26 = arith.cmpi eq, %arg1, %c3_i32 : i32
    %27 = arith.extui %26 : i1 to i32
    %c0_i32_18 = arith.constant 0 : i32
    %28 = arith.cmpi ne, %27, %c0_i32_18 : i32
    scf.if %28 {
      %c0_19 = arith.constant 0 : index
      %c0_20 = arith.constant 0 : index
      %29 = vector.load %arg7[%c0_19, %c0_20] : memref<16x1xf32, #tpu.memory_space<vmem>>, vector<16x1xf32>
      %c0_21 = arith.constant 0 : index
      %c0_22 = arith.constant 0 : index
      %30 = vector.load %arg8[%c0_21, %c0_22] : memref<16x1xf32, #tpu.memory_space<vmem>>, vector<16x1xf32>
      %31 = math.log %30 : vector<16x1xf32>
      %32 = arith.addf %29, %31 : vector<16x1xf32>
      %c0_23 = arith.constant 0 : index
      %c0_24 = arith.constant 0 : index
      %33 = vector.load %arg6[%c0_23, %c0_24] : memref<16x1xf32, #tpu.memory_space<vmem>>, vector<16x1xf32>
      tpu.vector_store %arg6[%c0_23, %c0_24], %32 {strides = array<i32>} : memref<16x1xf32, #tpu.memory_space<vmem>>, vector<16x1xf32>,
    } else {
    }
    return
  }
  func.func @transform_0(%arg0: i32, %arg1: i32) -> (i32, i32) {
    %c0_i32 = arith.constant 0 : i32
    %c0_i32_0 = arith.constant 0 : i32
    return %arg0, %c0_i32 : i32, i32
  }
  func.func @transform_1(%arg0: i32, %arg1: i32) -> (i32, i32) {
    %c0_i32 = arith.constant 0 : i32
    %c0_i32_0 = arith.constant 0 : i32
    return %arg1, %c0_i32 : i32, i32
  }
  func.func @transform_2(%arg0: i32, %arg1: i32) -> (i32, i32) {
    %c0_i32 = arith.constant 0 : i32
    %c0_i32_0 = arith.constant 0 : i32
    return %c0_i32, %arg1 : i32, i32
  }
  func.func @transform_3(%arg0: i32, %arg1: i32) -> (i32, i32) {
    %c0_i32 = arith.constant 0 : i32
    return %arg0, %arg1 : i32, i32
  }
  func.func @transform_4(%arg0: i32, %arg1: i32) -> (i32, i32) {
    %c0_i32 = arith.constant 0 : i32
    %c0_i32_0 = arith.constant 0 : i32
    return %arg0, %c0_i32 : i32, i32
  }
}

</mosaic_0001>

<bundles_post_ra>
// kernel: projection_layer_apply.1
= control target key start
LH: loop header
LB: loop body
LE: loop exit
PB: predicated region body
PF: predicated region fallthrough
CT: control target
= control target key end

     0   :  { %10 = vsyncpa [#allocation5], 0  ;;  %s1152_s0 = inlined_call_operand.vmem [shape: bf16[16,128], index: 0, kind: input, shape index: {}]   ;;  %s1153_s1 = inlined_call_operand.hbm [shape: bf16[1024,128], index: 1, kind: input, shape index: {}]   ;;  %s1154_s2 = inlined_call_operand.vmem [shape: f32[1,1024], index: 2, kind: input, shape index: {}]   ;;  %s1155_s3 = inlined_call_operand.vmem [shape: f32[16,1024], index: 3, kind: output, shape index: {0}]   ;;  %s1156_s4 = inlined_call_operand.vmem [shape: f32[16,1], index: 4, kind: output, shape index: {1}]  }
   0x1   :  { %12 = vsyncpa [#allocation5 + $0x1], 0  ;;  %s1002_s15 = smov 0   ;;  %s1004_s16 = smov 0  }
   0x2   :  { %s1006_s17 = smov 0   ;;  %s1008_s18 = smov 0  }
   0x3   :  { %s1010_s19 = smov 0   ;;  %s1012_s20 = smov 0  }
   0x4 LB: > { %s704_s21 = sadd.s32 4294967295, %s970_s20   ;;  %s27_s22 = sadd.s32 1, %s966_s19  ;;  %s970_s20 = sphi %s1012_s20, %s18_s20   ;;  %s966_s19 = sphi %s1010_s19, %s1164_s19   ;;  %s962_s18 = sphi %s1008_s18, %s1163_s18   ;;  %s958_s17 = sphi %s1006_s17, %s1162_s17   ;;  %s954_s16 = sphi %s1004_s16, %s1161_s16   ;;  %s950_s15 = sphi %s1002_s15, %s1160_s15  }
   0x5   : > { %p28_p0 = scmp.ge.s32.totalorder %s27_s22, 4  ;;  %s63_s23 = sadd.s32 1, %s958_s17 }
   0x6   : > { %p70_p1 = scmp.ne.s32.totalorder %s958_s17, %s954_s16  ;;  %p71_p2 = scmp.eq.s32.totalorder %s970_s20, 0 }
   0x7   : > { %s1166_s22 = smov (%p28_p0, %s27_s22), 0  ;;  %p76_p4 = scmp.ne.s32.totalorder %s954_s16, %s950_s15 }
   0x8   : > { %p1038_p3 = por %p71_p2, %p70_p1  ;;  %s60_s25 = ssub.s32 %s966_s19, %s1166_s22 }
   0x9   : > { %p77_p5 = scmp.eq.s32.totalorder %s704_s21, 0  ;;  %p61_p6 = scmp.eq.s32.totalorder %s60_s25, 0 }
   0xa   : > { %p128_p7 = scmp.eq.s32.totalorder %s704_s21, 3  ;;  %p818_p10 = scmp.lt.s32.totalorder %s970_s20, 4 }
   0xb   : > { %p1045_p8 = por %p77_p5, %p76_p4  ;;  %s189_s29 = sand.u32 1, %s958_s17  }
   0xc   : > { %s1050_s27 = scalar_select %p61_p6, %s958_s17, %s63_s23  }
   0xd   : > { %p1052_p9 = por %p128_p7, %p70_p1  ;;  %s793_s30 = sshll.u32 %s966_s19, 7 }
   0xe   : > { %s709_s5 = sshll.u32 %s189_s29, 7  ;;  %s198_s8 = scalar_lea.hbm %s1153_s1, %s793_s30 }
   0xf   : > { %s199_s9 = sshll.u32 %s198_s8, 4  ;;  %s193_s10 = scalar_lea.vmem [#allocation4], %s709_s5  ;;  %s200_s9 = int_to_ptr.hbm [resolvable:$true] %s199_s9 }
  0x10   : > { %s201_s11 = sshll.u32 %s193_s10, 4  ;;  %p815_p11 = pnand %p818_p10, %p1038_p3  ;;  %s202_s11 = int_to_ptr.vmem [resolvable:$true] %s201_s11 }
  0x11   : > { %p712_p12 = scmp.ge.s32.totalorder %s970_s20, 1  ;;  %p217_p13 = scmp.lt.s32.totalorder %s970_s20, 5 }
  0x12   : > { %s190_s12 = scalar_lea.sflag [#allocation5], %s189_s29  ;;  %s972_s13 = smov 64  }
  0x13   : > { %s973_s14 = smov 4   ;;  %p218_p0 = pnand %p712_p12, %p217_p13 }
  0x14   : > { %817 = dma.hbm_to_vmem [thread:$0]  (!%p815_p11), %s200_s9, 2048, %s202_s11, %s190_s12, %s972_s13, %s972_s13, %s973_s14  }
  0x15   : > { %221 = sbr.rel (%p218_p0) target bundleno = 635 (0x27b), region = 32  ;;  %s223_s15 = sand.u32 (!%p218_p0), 1, %s954_s16  }
  0x16   : > { %s713_s21 = sshll.u32 (!%p218_p0), %s223_s15, 7  ;;  %s224_s23 = scalar_lea.sflag (!%p218_p0), [#allocation5], %s223_s15 }
  0x17   : > { %s1067_s25 = scalar_lea.vmem (!%p218_p0), [#allocation4], %s713_s21 }
  0x1a   : > { %945 = dma.done.wait (%p1045_p8), %s224_s23, 2048  }
  0x1b   : > { %947 = vsyncadd (%p1045_p8), %s224_s23, 4294965248  ;;  %s714_s24 = sshll.u32 %s223_s15, 5  ;;  %s715_s29 = sshll.u32 %s962_s18, 1 }
  0x1c   : > { %p274_p1 = scmp.lt.s32.totalorder %s715_s29, 7  ;;  %s1080_s7 = scalar_lea.vmem [#allocation6], %s714_s24 }
  0x1d   : > { %p716_p2 = scmp.ne.s32.totalorder %s962_s18, 0 }
  0x1e   : > { %s1168_s29 = smov (!%p274_p1, %s715_s29), 7 }
  0x1f   : > { %s276_s6 = scalar_lea.vmem %s1154_s2, %s1168_s29  ;;  %289 = sbr.rel (%p716_p2) target bundleno = 41 (0x29), region = 40 }
  0x24   : > { %vm290_vm0 = vcmask 7168   ;;  %v974_v0 = vmov -inf   ;;  %v975_v1 = vmov 0.0  }
  0x25   : > { %291 = vst.msk [vmem:[#allocation2] sm:$0xff] %vm290_vm0, %v974_v0 }
  0x26   : > { %292 = vst.msk [vmem:[#allocation2 + $0x8] sm:$0xff] %vm290_vm0, %v974_v0 }
  0x27   : > { %293 = vst.msk [vmem:[#allocation3] sm:$0xff] %vm290_vm0, %v975_v1 }
  0x28   : > { %294 = vst.msk [vmem:[#allocation3 + $0x8] sm:$0xff] %vm290_vm0, %v975_v1 }
  0x29 PF: > { %v802_v2 = vld [vmem:[%s1067_s25 + $0x38] sm:$0xff]  ;;  %v801_v4 = vld [vmem:[%s1067_s25 + $0x30] sm:$0xff]  ;;  %v800_v6 = vld [vmem:[%s1067_s25 + $0x28] sm:$0xff]  ;;  %v976_v32 = vmov 0   ;;  %vm519_vm1 = vcmask 7168   ;;  %p785_p3 = scmp.ne.s32.totalorder %s962_s18, 3 }
  0x2a   : > { %v810_v3 = vld [vmem:[%s1067_s25 + $0x78] sm:$0xff]  ;;  %437 = vmatpush.bf16.xpose.msra.mxu0 %v802_v2  ;;  %v809_v5 = vld [vmem:[%s1067_s25 + $0x70] sm:$0xff]  ;;  %v808_v7 = vld [vmem:[%s1067_s25 + $0x68] sm:$0xff]  ;;  %872 = vset.pattern.permute.xlu1 %v976_v32 }
  0x2b   : > { %451 = vmatpush.bf16.xpose.msra.mxu1 %v810_v3  ;;  %v799_v8 = vld [vmem:[%s1067_s25 + $0x20] sm:$0xff]  ;;  %v798_v10 = vld [vmem:[%s1067_s25 + $0x18] sm:$0xff]  ;;  %v797_v12 = vld [vmem:[%s1067_s25 + $0x10] sm:$0xff]  ;;  %873 = vset.pattern.permute.xlu0 %v976_v32 }
  0x2c   : > { %v807_v9 = vld [vmem:[%s1067_s25 + $0x60] sm:$0xff]  ;;  %v806_v11 = vld [vmem:[%s1067_s25 + $0x58] sm:$0xff]  ;;  %v805_v13 = vld [vmem:[%s1067_s25 + $0x50] sm:$0xff] }
  0x2d   : > { %v796_v14 = vld [vmem:[%s1067_s25 + $0x8] sm:$0xff]  ;;  %v795_v16 = vld [vmem:[%s1067_s25] sm:$0xff] }
  0x2e   : > { %v804_v15 = vld [vmem:[%s1067_s25 + $0x48] sm:$0xff]  ;;  %v803_v17 = vld [vmem:[%s1067_s25 + $0x40] sm:$0xff]  ;;  %v485_v60 = vld [vmem:[#allocation3] sm:$0xff] }
  0x2f   : > { %v794_v18 = vld [vmem:[%s1152_s0] sm:$0xff]  ;;  %v470_v37 = vld [vmem:[#allocation2 + $0x8] sm:$0xff]  ;;  %v486_v1 = vld [vmem:[#allocation3 + $0x8] sm:$0xff] }
  0x30   : > { %v329_v19 = vld [vmem:[%s276_s6] sm:$0x3] }
  0x31   : > { %v331_v20 = vperm.slane %v329_v19, 0  ;;  %v332_v21 = vperm.slane %v329_v19, 1  ;;  %v469_v33 = vld [vmem:[#allocation2] sm:$0xff] }
  0x32   : > { %438 = vmatpush.bf16.xpose.msra.mxu0 %v801_v4 }
  0x33   : > { %452 = vmatpush.bf16.xpose.msra.mxu1 %v809_v5 }
  0x3a   : > { %439 = vmatpush.bf16.xpose.msra.mxu0 %v800_v6 }
  0x3b   : > { %453 = vmatpush.bf16.xpose.msra.mxu1 %v808_v7 }
  0x42   : > { %440 = vmatpush.bf16.xpose.msra.mxu0 %v799_v8 }
  0x43   : > { %454 = vmatpush.bf16.xpose.msra.mxu1 %v807_v9 }
  0x4a   : > { %441 = vmatpush.bf16.xpose.msra.mxu0 %v798_v10 }
  0x4b   : > { %455 = vmatpush.bf16.xpose.msra.mxu1 %v806_v11 }
  0x52   : > { %442 = vmatpush.bf16.xpose.msra.mxu0 %v797_v12 }
  0x53   : > { %456 = vmatpush.bf16.xpose.msra.mxu1 %v805_v13 }
  0x5a   : > { %443 = vmatpush.bf16.xpose.msra.mxu0 %v796_v14 }
  0x5b   : > { %457 = vmatpush.bf16.xpose.msra.mxu1 %v804_v15 }
  0x62   : > { %444 = vmatpush.bf16.xpose.msra.mxu0 %v795_v16 }
  0x63   : > { %458 = vmatpush.bf16.xpose.msra.mxu1 %v803_v17 }
  0x69   : > { %445 = vmatmul.bf16.vlgmr.msra.gmra.mxu0 %v794_v18 }
  0x6a   : > { %459 = vmatmul.bf16.vlgmr.msra.gmra.mxu1 %v794_v18 }
  0xe6   : > { %v446_v22 = vpop.f32.mrf.mxu0 }
  0xe7   : > { %v460_v23 = vpop.f32.mrf.mxu1  ;;  %v447_v24 = vadd.f32 %v446_v22, %v331_v20 }
  0xe8   : > { %v461_v25 = vadd.f32 %v460_v23, %v332_v21 }
  0xe9   : > { %465 = vst [vmem:[%s1080_s7] sm:$0xff] %v447_v24 }
  0xea   : > { %v471_v26 = vmax.f32 %v447_v24, %v461_v25  ;;  %466 = vst [vmem:[%s1080_s7 + $0x8] sm:$0xff] %v461_v25 }
  0xec   : > { %472 = vmax.xlane.f32.xlu0 %v471_v26 }
  0xee   : > { %v448_v27 = vpop.f32.mrf.mxu0 }
  0xef   : > { %v462_v28 = vpop.f32.mrf.mxu1  ;;  %v449_v29 = vadd.f32 %v448_v27, %v331_v20 }
  0xf0   : > { %v463_v30 = vadd.f32 %v462_v28, %v332_v21 }
  0xf1   : > { %467 = vst [vmem:[%s1080_s7 + $0x10] sm:$0xff] %v449_v29 }
  0xf2   : > { %v474_v31 = vmax.f32 %v449_v29, %v463_v30  ;;  %468 = vst [vmem:[%s1080_s7 + $0x18] sm:$0xff] %v463_v30 }
  0xf4   : > { %475 = vmax.xlane.f32.xlu0 %v474_v31 }
 0x15f   : > { %v473_v34 = vpop.xlane.xlu0 %472 }
 0x160   : > { %v477_v35 = vmax.f32 %v469_v33, %v473_v34 }
 0x162   : > { %v479_v36 = vsub.f32 %v469_v33, %v477_v35  ;;  %522 = vst.msk [vmem:[#allocation2] sm:$0xff] %vm519_vm1, %v477_v35  ;;  %491 = vperm.xlu1 %872, %v477_v35  }
 0x164   : > { %v481_v57 = vmul.f32 1.442695, %v479_v36 }
 0x167   : > { %v476_v38 = vpop.xlane.xlu0 %475 }
 0x168   : > { %v478_v39 = vmax.f32 %v470_v37, %v476_v38 }
 0x16a   : > { %v480_v40 = vsub.f32 %v470_v37, %v478_v39  ;;  %523 = vst.msk [vmem:[#allocation2 + $0x8] sm:$0xff] %vm519_vm1, %v478_v39  ;;  %496 = vperm.xlu1 %872, %v478_v39  }
 0x16c   : > { %v483_v58 = vmul.f32 1.442695, %v480_v40 }
 0x1d4   : > { %v492_v41 = vpop.permute.xlu1 %491 }
 0x1d5   : > { %v499_v42 = vsub.f32 %v447_v24, %v492_v41  ;;  %v500_v43 = vsub.f32 %v461_v25, %v492_v41 }
 0x1d7   : > { %v503_v44 = vmul.f32 1.442695, %v499_v42  ;;  %v505_v45 = vmul.f32 1.442695, %v500_v43 }
 0x1d9   : > { %874 = vpow2.f32 %v503_v44 }
 0x1da   : > { %876 = vpow2.f32 %v505_v45 }
 0x1dc   : > { %v497_v46 = vpop.permute.xlu1 %496 }
 0x1dd   : > { %v501_v47 = vsub.f32 %v449_v29, %v497_v46  ;;  %v502_v48 = vsub.f32 %v463_v30, %v497_v46 }
 0x1df   : > { %v875_v49 = vpop.eup %874  ;;  %v507_v50 = vmul.f32 1.442695, %v501_v47  ;;  %v509_v51 = vmul.f32 1.442695, %v502_v48 }
 0x1e0   : > { %v877_v52 = vpop.eup %876 }
 0x1e1   : > { %878 = vpow2.f32 %v507_v50  ;;  %v511_v53 = vadd.f32 %v877_v52, %v875_v49 }
 0x1e2   : > { %880 = vpow2.f32 %v509_v51 }
 0x1e3   : > { %512 = vadd.xlane.f32.xlu2 %v511_v53  ;;  %882 = vpow2.f32 %v481_v57 }
 0x1e4   : > { %884 = vpow2.f32 %v483_v58 }
 0x1e7   : > { %v879_v54 = vpop.eup %878 }
 0x1e8   : > { %v881_v55 = vpop.eup %880 }
 0x1e9   : > { %v514_v56 = vadd.f32 %v881_v55, %v879_v54  ;;  %v883_v59 = vpop.eup %882 }
 0x1ea   : > { %v487_v61 = vmul.f32 %v883_v59, %v485_v60  ;;  %v885_v0 = vpop.eup %884 }
 0x1eb   : > { %515 = vadd.xlane.f32.xlu2 %v514_v56  ;;  %v488_v2 = vmul.f32 %v885_v0, %v486_v1 }
 0x256   : > { %v513_v62 = vpop.xlane.xlu2 %512 }
 0x257   : > { %v517_v63 = vadd.f32 %v513_v62, %v487_v61 }
 0x259   : > { %520 = vst.msk [vmem:[#allocation3] sm:$0xff] %vm519_vm1, %v517_v63 }
 0x25d   : > { %527 = sbr.rel (%p785_p3) target bundleno = 629 (0x275), region = 44 }
 0x25e   : > { %v516_v3 = vpop.xlane.xlu2 %515 }
 0x25f   : > { %v518_v4 = vadd.f32 %v516_v3, %v488_v2 }
 0x261   : > { %521 = vst.msk [vmem:[#allocation3 + $0x8] sm:$0xff] %vm519_vm1, %v518_v4 }
 0x262   : > { %v530_v5 = vld [vmem:[#allocation3] sm:$0xff]  ;;  %v528_v8 = vld [vmem:[#allocation2] sm:$0xff]  ;;  %v529_v11 = vld [vmem:[#allocation2 + $0x8] sm:$0xff] }
 0x263   : > { %886 = vlog2.f32 %v530_v5 }
 0x268   : > { %v531_v6 = vld [vmem:[#allocation3 + $0x8] sm:$0xff] }
 0x269   : > { %888 = vlog2.f32 %v531_v6  ;;  %v887_v7 = vpop.eup %886 }
 0x26a   : > { %v533_v10 = vmul.f32 0.6931472, %v887_v7 }
 0x26c   : > { %v536_v13 = vadd.f32 %v533_v10, %v528_v8 }
 0x26e   : > { %538 = vst.msk [vmem:[%s1156_s4] sm:$0xff] %vm519_vm1, %v536_v13 }
 0x26f   : > { %v889_v9 = vpop.eup %888 }
 0x270   : > { %v535_v12 = vmul.f32 0.6931472, %v889_v9 }
 0x272   : > { %v537_v14 = vadd.f32 %v535_v12, %v529_v11 }
 0x274   : > { %539 = vst.msk [vmem:[%s1156_s4 + $0x8] sm:$0xff] %vm519_vm1, %v537_v14 }
 0x275 PF: > { %551 = sbr.rel (!%p1052_p9) target bundleno = 635 (0x27b), region = 48  ;;  %s811_s15 = sshll.u32 (%p1052_p9), %s962_s18, 4  ;;  %v570_v15 = vld [vmem:[%s1080_s7] sm:$0xff] (%p1052_p9)  ;;  %v572_v16 = vld [vmem:[%s1080_s7 + $0x8] sm:$0xff] (%p1052_p9)  ;;  %v574_v17 = vld [vmem:[%s1080_s7 + $0x10] sm:$0xff] (%p1052_p9) }
 0x276   : > { %s557_s25 = scalar_lea.vmem (%p1052_p9), %s1155_s3, %s811_s15  ;;  %v576_v18 = vld [vmem:[%s1080_s7 + $0x18] sm:$0xff] (%p1052_p9) }
 0x277   : > { %571 = vst [vmem:[%s557_s25] sm:$0xff] (%p1052_p9), %v570_v15 }
 0x278   : > { %573 = vst [vmem:[%s557_s25 + $0x8] sm:$0xff] (%p1052_p9), %v572_v16 }
 0x279   : > { %575 = vst [vmem:[%s557_s25 + $0x40] sm:$0xff] (%p1052_p9), %v574_v17 }
 0x27a   : > { %577 = vst [vmem:[%s557_s25 + $0x48] sm:$0xff] %v576_v18 }
 0x27b PF: > { %s18_s20 = sadd.s32 1, %s970_s20   ;;  %s1160_s15 = smov %s954_s16 }
 0x27c   : > { %p15_p4 = scmp.ge.s32.totalorder %s18_s20, 6   ;;  %s1161_s16 = smov %s958_s17 }
 0x27d   : > { %s1162_s17 = smov %s1050_s27  ;;  %s1163_s18 = smov %s966_s19 }
 0x27e   : > { %s1164_s19 = smov %s1166_s22  ;;  %17 = sbr.rel (!%p15_p4) target bundleno = 4 (0x4), region = 121 }
 0x283   :  { %605 = vsyncpa [#allocation5], 1 }
 0x284   :  { %607 = vsyncpa [#allocation5 + $0x1], 1 }

</bundles_post_ra>
